<compile_context>
chip_gen: v5e
topology: v5e:2x2
jax: 0.10.0
libtpu: 0.0.40
codegen_flags: <defaults>
</compile_context>

<pallas_src>
import functools

import jax
import jax.numpy as jnp
from jax import lax
from jax.experimental import pallas as pl
from jax.experimental.pallas import tpu as pltpu

BOND_FEATURE_DIMS = [22, 6, 2]   # len(e_map['bond_type']), len(e_map['stereo']), len(e_map['is_conjugated'])
NUM_FEATURES = len(BOND_FEATURE_DIMS)


def _round_up(x, m):
    return ((x + m - 1) // m) * m


def _xavier_uniform(key, shape):
    fan_in, fan_out = shape[0], shape[1]
    bound = (6.0 / (fan_in + fan_out)) ** 0.5
    return jax.random.uniform(key, shape, jnp.float32, minval=-bound, maxval=bound)


def init_bond_encoder_params(key, emb_dim):
    keys = jax.random.split(key, NUM_FEATURES)
    return [_xavier_uniform(k, (d, emb_dim)) for k, d in zip(keys, BOND_FEATURE_DIMS)]


def _layout_params(emb_dim):
    """Static layout parameters derived from emb_dim and BOND_FEATURE_DIMS."""
    dims = BOND_FEATURE_DIMS
    offsets, acc = [], 0
    for d in dims:
        offsets.append(acc)
        acc += d
    offsets = tuple(offsets)

    if emb_dim % 128 == 0:
        rps, d_out = 1, emb_dim                        # already lane dense
    elif 128 % emb_dim == 0:
        rps, d_out = 128 // emb_dim, 128               # pack rps edges per 128-wide row
    else:
        rps, d_out = 1, _round_up(emb_dim, 128)        # pad D, slice after

    v_total = sum(dims)                                # 30
    v_pad = _round_up(v_total, 8)                      # 32 (sublane aligned)
    return offsets, rps, d_out, v_pad, v_total


def make_fused_table(tables):
    """Build the fused block-diagonal table ONCE at init (hoisted out of fwd)."""
    emb_dim = int(tables[0].shape[1])
    offsets, rps, d_out, v_pad, v_total = _layout_params(emb_dim)
    fused = jnp.concatenate(tables, axis=0)                          # (30, D)
    fused = jnp.pad(fused, ((0, v_pad - v_total), (0, d_out // rps - emb_dim)))
    table = jnp.kron(jnp.eye(rps, dtype=fused.dtype), fused)         # (rps*v_pad, d_out)
    return jax.device_put(table)


def bond_encoder_kernel(idx_ref, table_ref, out_ref, *, rps, v_pad, offsets):
    # idx_ref:   (BR, rps*nf) int32 -- raw (un-offset) bond feature indices,
    #            rps consecutive edges packed per row.
    # table_ref: (rps*v_pad, d_out) f32 -- block-diagonal fused embedding table.
    # out_ref:   (BR, d_out) f32 -- rps consecutive edge embeddings per row
    #            (lane-dense: d_out is a multiple of 128).
    idx = idx_ref[...]
    br = idx.shape[0]
    k = table_ref.shape[0]
    nf = len(offsets)

    lane = lax.broadcasted_iota(jnp.int32, (br, k), 1)

    # All rps*nf one-hot targets hit pairwise-disjoint lanes (feature offsets
    # 0/22/28 inside each v_pad-wide group, groups block-diagonal), so the
    # masks can be OR-accumulated as booleans and cast to f32 exactly once
    # right before the MXU matmul (single convert instead of 12 converts +
    # 11 f32 adds on the VALU).
    mask = None
    for j in range(rps):
        base = j * v_pad
        for i, off in enumerate(offsets):
            col = idx[:, j * nf + i][:, None] + (base + off)
            hit = lane == col
            mask = hit if mask is None else (mask | hit)

    out_ref[...] = jnp.dot(mask.astype(jnp.float32), table_ref[...],
                           preferred_element_type=jnp.float32)


@functools.partial(jax.jit, static_argnames=("emb_dim", "block_e"))
def bond_encoder_forward(edge_attr, table, *, emb_dim, block_e=8192):
    """edge_attr: (E, nf) integer; table: fused table from make_fused_table."""
    e = int(edge_attr.shape[0])
    nf = int(edge_attr.shape[1])
    offsets, rps, d_out, v_pad, _ = _layout_params(emb_dim)

    # Row blocking: blocks of `blk` edges (BR = blk // rps packed rows, multiple of 8).
    row_quantum = 8 * rps
    bytes_per_edge_out = 4 * (d_out // rps)
    # Keep the per-step output block <= ~2 MiB so double-buffering stays well
    # inside the scoped VMEM default for any emb_dim.
    vmem_cap = max(row_quantum,
                   ((2 * 1024 * 1024) // bytes_per_edge_out // row_quantum) * row_quantum)
    blk = min(block_e, vmem_cap, _round_up(e, row_quantum))
    blk = max(row_quantum, (blk // row_quantum) * row_quantum)

    # v7x megacore: the "parallel" grid axis only shards across the 2 TCs if
    # there are >= 2 grid steps.  Split mid-size E into two halves as long as
    # each half still writes >= ~512 KiB of output.  No-op on 1-TC chips and
    # on tiny inputs.
    min_half_edges = _round_up(
        max(row_quantum, (512 * 1024 + bytes_per_edge_out - 1) // bytes_per_edge_out),
        row_quantum)
    if _round_up(e, blk) // blk < 2 and e >= 2 * min_half_edges:
        blk = _round_up((e + 1) // 2, row_quantum)

    e_pad = _round_up(e, blk)

    idx = edge_attr.astype(jnp.int32)
    if e_pad != e:
        idx = jnp.pad(idx, ((0, e_pad - e), (0, 0)))   # padded rows sliced off below
    idx_packed = idx.reshape(e_pad // rps, rps * nf)   # free row-major reshape

    br = blk // rps
    grid = (e_pad // blk,)
    kernel = functools.partial(bond_encoder_kernel,
                               rps=rps, v_pad=v_pad, offsets=offsets)

    out_packed = pl.pallas_call(
        kernel,
        out_shape=jax.ShapeDtypeStruct((e_pad // rps, d_out), jnp.float32),
        grid_spec=pltpu.PrefetchScalarGridSpec(
            num_scalar_prefetch=0,
            grid=grid,
            in_specs=[
                pl.BlockSpec((br, rps * nf), lambda i: (i, 0)),
                # Constant index_map (0,0): Pallas re-uses the resident block
                # across grid steps (no re-DMA); the extra double-buffer is
                # only 64-256 KiB, so no pipeline_mode override is needed.
                pl.BlockSpec((rps * v_pad, d_out), lambda i: (0, 0)),
            ],
            out_specs=pl.BlockSpec((br, d_out), lambda i: (i, 0)),
        ),
        compiler_params=pltpu.CompilerParams(
            dimension_semantics=("parallel",)),
    )(idx_packed, table)

    # Unpack (free reshape), drop row/column padding.
    out = out_packed.reshape(e_pad, d_out // rps)
    return out[:e, :emb_dim]


def bond_encoder_reference(edge_attr, tables):
    out = 0
    for i in range(edge_attr.shape[1]):
        out = out + tables[i][edge_attr[:, i]]
    return out


if __name__ == "__main__":
    key = jax.random.PRNGKey(0)
    emb_dim = 32
    num_edges = 16

    k_params, k_idx = jax.random.split(key)
    tables = init_bond_encoder_params(k_params, emb_dim)
    fused_table = make_fused_table(tables)             # built once at init

    cols = []
    ks = jax.random.split(k_idx, NUM_FEATURES)
    for kf, dim in zip(ks, BOND_FEATURE_DIMS):
        cols.append(jax.random.randint(kf, (num_edges,), 0, dim, dtype=jnp.int32))
    edge_attr = jnp.stack(cols, axis=1)                # (16, 3) int32

    out = bond_encoder_forward(edge_attr, fused_table, emb_dim=emb_dim)
    out = jax.block_until_ready(out)

    ref = bond_encoder_reference(edge_attr, tables)
    assert out.shape == (num_edges, emb_dim)
    assert jnp.allclose(out, ref, atol=1e-5, rtol=1e-5), "mismatch vs reference"
    print("KERNEL_OK")
</pallas_src>

<mosaic_0001>
module attributes {stable_mosaic.version = 11 : i64} {
  func.func @bond_encoder_kernel(%arg0: i32, %arg1: memref<8x12xi32, #tpu.memory_space<vmem>>, %arg2: memref<128x128xf32, #tpu.memory_space<vmem>>, %arg3: memref<8x128xf32, #tpu.memory_space<vmem>>) attributes {dimension_semantics = [#tpu.dimension_semantics<parallel>], iteration_bounds = array<i64: 1>, scalar_prefetch = 0 : i64, scratch_operands = 0 : i64, tpu.core_type = #tpu.core_type<tc>, window_params = [{transform_indices = @transform_0, window_bounds = array<i64: 8, 12>}, {pipeline_mode = #tpu.pipeline_mode<synchronous>, transform_indices = @transform_1, window_bounds = array<i64: 128, 128>}, {transform_indices = @transform_2, window_bounds = array<i64: 8, 128>}]} {
    %c0 = arith.constant 0 : index
    %c0_0 = arith.constant 0 : index
    %0 = vector.load %arg1[%c0, %c0_0] : memref<8x12xi32, #tpu.memory_space<vmem>>, vector<8x12xi32>
    %1 = tpu.iota {dimensions = array<i32: 1>} : vector<8x128xi32>
    %2 = vector.extract_strided_slice %0 {offsets = [0, 0], sizes = [8, 1], strides = [1, 1]} : vector<8x12xi32> to vector<8x1xi32>
    %3 = vector.shape_cast %2 : vector<8x1xi32> to vector<8xi32>
    %4 = vector.shape_cast %3 : vector<8xi32> to vector<8x1xi32>
    %c0_i32 = arith.constant 0 : i32
    %5 = vector.broadcast %c0_i32 : i32 to vector<8x1xi32>
    %6 = arith.addi %4, %5 : vector<8x1xi32>
    %7 = vector.broadcast %6 : vector<8x1xi32> to vector<8x128xi32>
    %8 = arith.cmpi eq, %1, %7 : vector<8x128xi32>
    %9 = vector.extract_strided_slice %0 {offsets = [0, 1], sizes = [8, 1], strides = [1, 1]} : vector<8x12xi32> to vector<8x1xi32>
    %10 = vector.shape_cast %9 : vector<8x1xi32> to vector<8xi32>
    %11 = vector.shape_cast %10 : vector<8xi32> to vector<8x1xi32>
    %c22_i32 = arith.constant 22 : i32
    %12 = vector.broadcast %c22_i32 : i32 to vector<8x1xi32>
    %13 = arith.addi %11, %12 : vector<8x1xi32>
    %14 = vector.broadcast %13 : vector<8x1xi32> to vector<8x128xi32>
    %15 = arith.cmpi eq, %1, %14 : vector<8x128xi32>
    %16 = arith.ori %8, %15 : vector<8x128xi1>
    %17 = vector.extract_strided_slice %0 {offsets = [0, 2], sizes = [8, 1], strides = [1, 1]} : vector<8x12xi32> to vector<8x1xi32>
    %18 = vector.shape_cast %17 : vector<8x1xi32> to vector<8xi32>
    %19 = vector.shape_cast %18 : vector<8xi32> to vector<8x1xi32>
    %c28_i32 = arith.constant 28 : i32
    %20 = vector.broadcast %c28_i32 : i32 to vector<8x1xi32>
    %21 = arith.addi %19, %20 : vector<8x1xi32>
    %22 = vector.broadcast %21 : vector<8x1xi32> to vector<8x128xi32>
    %23 = arith.cmpi eq, %1, %22 : vector<8x128xi32>
    %24 = arith.ori %16, %23 : vector<8x128xi1>
    %25 = vector.extract_strided_slice %0 {offsets = [0, 3], sizes = [8, 1], strides = [1, 1]} : vector<8x12xi32> to vector<8x1xi32>
    %26 = vector.shape_cast %25 : vector<8x1xi32> to vector<8xi32>
    %27 = vector.shape_cast %26 : vector<8xi32> to vector<8x1xi32>
    %c32_i32 = arith.constant 32 : i32
    %28 = vector.broadcast %c32_i32 : i32 to vector<8x1xi32>
    %29 = arith.addi %27, %28 : vector<8x1xi32>
    %30 = vector.broadcast %29 : vector<8x1xi32> to vector<8x128xi32>
    %31 = arith.cmpi eq, %1, %30 : vector<8x128xi32>
    %32 = arith.ori %24, %31 : vector<8x128xi1>
    %33 = vector.extract_strided_slice %0 {offsets = [0, 4], sizes = [8, 1], strides = [1, 1]} : vector<8x12xi32> to vector<8x1xi32>
    %34 = vector.shape_cast %33 : vector<8x1xi32> to vector<8xi32>
    %35 = vector.shape_cast %34 : vector<8xi32> to vector<8x1xi32>
    %c54_i32 = arith.constant 54 : i32
    %36 = vector.broadcast %c54_i32 : i32 to vector<8x1xi32>
    %37 = arith.addi %35, %36 : vector<8x1xi32>
    %38 = vector.broadcast %37 : vector<8x1xi32> to vector<8x128xi32>
    %39 = arith.cmpi eq, %1, %38 : vector<8x128xi32>
    %40 = arith.ori %32, %39 : vector<8x128xi1>
    %41 = vector.extract_strided_slice %0 {offsets = [0, 5], sizes = [8, 1], strides = [1, 1]} : vector<8x12xi32> to vector<8x1xi32>
    %42 = vector.shape_cast %41 : vector<8x1xi32> to vector<8xi32>
    %43 = vector.shape_cast %42 : vector<8xi32> to vector<8x1xi32>
    %c60_i32 = arith.constant 60 : i32
    %44 = vector.broadcast %c60_i32 : i32 to vector<8x1xi32>
    %45 = arith.addi %43, %44 : vector<8x1xi32>
    %46 = vector.broadcast %45 : vector<8x1xi32> to vector<8x128xi32>
    %47 = arith.cmpi eq, %1, %46 : vector<8x128xi32>
    %48 = arith.ori %40, %47 : vector<8x128xi1>
    %49 = vector.extract_strided_slice %0 {offsets = [0, 6], sizes = [8, 1], strides = [1, 1]} : vector<8x12xi32> to vector<8x1xi32>
    %50 = vector.shape_cast %49 : vector<8x1xi32> to vector<8xi32>
    %51 = vector.shape_cast %50 : vector<8xi32> to vector<8x1xi32>
    %c64_i32 = arith.constant 64 : i32
    %52 = vector.broadcast %c64_i32 : i32 to vector<8x1xi32>
    %53 = arith.addi %51, %52 : vector<8x1xi32>
    %54 = vector.broadcast %53 : vector<8x1xi32> to vector<8x128xi32>
    %55 = arith.cmpi eq, %1, %54 : vector<8x128xi32>
    %56 = arith.ori %48, %55 : vector<8x128xi1>
    %57 = vector.extract_strided_slice %0 {offsets = [0, 7], sizes = [8, 1], strides = [1, 1]} : vector<8x12xi32> to vector<8x1xi32>
    %58 = vector.shape_cast %57 : vector<8x1xi32> to vector<8xi32>
    %59 = vector.shape_cast %58 : vector<8xi32> to vector<8x1xi32>
    %c86_i32 = arith.constant 86 : i32
    %60 = vector.broadcast %c86_i32 : i32 to vector<8x1xi32>
    %61 = arith.addi %59, %60 : vector<8x1xi32>
    %62 = vector.broadcast %61 : vector<8x1xi32> to vector<8x128xi32>
    %63 = arith.cmpi eq, %1, %62 : vector<8x128xi32>
    %64 = arith.ori %56, %63 : vector<8x128xi1>
    %65 = vector.extract_strided_slice %0 {offsets = [0, 8], sizes = [8, 1], strides = [1, 1]} : vector<8x12xi32> to vector<8x1xi32>
    %66 = vector.shape_cast %65 : vector<8x1xi32> to vector<8xi32>
    %67 = vector.shape_cast %66 : vector<8xi32> to vector<8x1xi32>
    %c92_i32 = arith.constant 92 : i32
    %68 = vector.broadcast %c92_i32 : i32 to vector<8x1xi32>
    %69 = arith.addi %67, %68 : vector<8x1xi32>
    %70 = vector.broadcast %69 : vector<8x1xi32> to vector<8x128xi32>
    %71 = arith.cmpi eq, %1, %70 : vector<8x128xi32>
    %72 = arith.ori %64, %71 : vector<8x128xi1>
    %73 = vector.extract_strided_slice %0 {offsets = [0, 9], sizes = [8, 1], strides = [1, 1]} : vector<8x12xi32> to vector<8x1xi32>
    %74 = vector.shape_cast %73 : vector<8x1xi32> to vector<8xi32>
    %75 = vector.shape_cast %74 : vector<8xi32> to vector<8x1xi32>
    %c96_i32 = arith.constant 96 : i32
    %76 = vector.broadcast %c96_i32 : i32 to vector<8x1xi32>
    %77 = arith.addi %75, %76 : vector<8x1xi32>
    %78 = vector.broadcast %77 : vector<8x1xi32> to vector<8x128xi32>
    %79 = arith.cmpi eq, %1, %78 : vector<8x128xi32>
    %80 = arith.ori %72, %79 : vector<8x128xi1>
    %81 = vector.extract_strided_slice %0 {offsets = [0, 10], sizes = [8, 1], strides = [1, 1]} : vector<8x12xi32> to vector<8x1xi32>
    %82 = vector.shape_cast %81 : vector<8x1xi32> to vector<8xi32>
    %83 = vector.shape_cast %82 : vector<8xi32> to vector<8x1xi32>
    %c118_i32 = arith.constant 118 : i32
    %84 = vector.broadcast %c118_i32 : i32 to vector<8x1xi32>
    %85 = arith.addi %83, %84 : vector<8x1xi32>
    %86 = vector.broadcast %85 : vector<8x1xi32> to vector<8x128xi32>
    %87 = arith.cmpi eq, %1, %86 : vector<8x128xi32>
    %88 = arith.ori %80, %87 : vector<8x128xi1>
    %89 = vector.extract_strided_slice %0 {offsets = [0, 11], sizes = [8, 1], strides = [1, 1]} : vector<8x12xi32> to vector<8x1xi32>
    %90 = vector.shape_cast %89 : vector<8x1xi32> to vector<8xi32>
    %91 = vector.shape_cast %90 : vector<8xi32> to vector<8x1xi32>
    %c124_i32 = arith.constant 124 : i32
    %92 = vector.broadcast %c124_i32 : i32 to vector<8x1xi32>
    %93 = arith.addi %91, %92 : vector<8x1xi32>
    %94 = vector.broadcast %93 : vector<8x1xi32> to vector<8x128xi32>
    %95 = arith.cmpi eq, %1, %94 : vector<8x128xi32>
    %96 = arith.ori %88, %95 : vector<8x128xi1>
    %97 = arith.extui %96 : vector<8x128xi1> to vector<8x128xi32>
    %98 = arith.sitofp %97 : vector<8x128xi32> to vector<8x128xf32>
    %c0_1 = arith.constant 0 : index
    %c0_2 = arith.constant 0 : index
    %99 = vector.load %arg2[%c0_1, %c0_2] : memref<128x128xf32, #tpu.memory_space<vmem>>, vector<128x128xf32>
    %cst = arith.constant dense<0.000000e+00> : vector<8x128xf32>
    %100 = tpu.matmul %98, %99, %cst {dimension_numbers = #tpu.dot_dimension_numbers<[1], [0], [0], [1], [0, 0, 1, 1], [], []>} : vector<8x128xf32>, vector<128x128xf32>, vector<8x128xf32> -> vector<8x128xf32>
    %c0_3 = arith.constant 0 : index
    %c0_4 = arith.constant 0 : index
    %101 = vector.load %arg3[%c0_3, %c0_4] : memref<8x128xf32, #tpu.memory_space<vmem>>, vector<8x128xf32>
    tpu.vector_store %arg3[%c0_3, %c0_4], %100 {strides = array<i32>} : memref<8x128xf32, #tpu.memory_space<vmem>>, vector<8x128xf32>,
    return
  }
  func.func @transform_0(%arg0: i32) -> (i32, i32) {
    %c0_i32 = arith.constant 0 : i32
    %c0_i32_0 = arith.constant 0 : i32
    return %arg0, %c0_i32 : i32, i32
  }
  func.func @transform_1(%arg0: i32) -> (i32, i32) {
    %c0_i32 = arith.constant 0 : i32
    %c0_i32_0 = arith.constant 0 : i32
    %c0_i32_1 = arith.constant 0 : i32
    return %c0_i32, %c0_i32_0 : i32, i32
  }
  func.func @transform_2(%arg0: i32) -> (i32, i32) {
    %c0_i32 = arith.constant 0 : i32
    %c0_i32_0 = arith.constant 0 : i32
    return %arg0, %c0_i32 : i32, i32
  }
}

</mosaic_0001>

<bundles_post_ra>
// kernel: bond_encoder_forward.1
= control target key start
LH: loop header
LB: loop body
LE: loop exit
PB: predicated region body
PF: predicated region fallthrough
CT: control target
= control target key end

     0   :  { %7 = vsyncpa [#allocation3], 0  ;;  %s200_s12 = smov [#allocation2]   ;;  %s201_s14 = smov 128   ;;  %s240_s0 = inlined_call_operand.vmem [shape: s32[8,12], index: 0, kind: input, shape index: {}]   ;;  %s241_s1 = inlined_call_operand.hbm [shape: f32[128,128], index: 1, kind: input, shape index: {}]   ;;  %s242_s2 = inlined_call_operand.vmem [shape: f32[8,128], index: 2, kind: output, shape index: {}]  }
   0x1   :  { %s14_s11 = sshll.u32 %s241_s1, 4  ;;  %s16_s13 = sshll.u32 %s200_s12, 4  ;;  %s15_s11 = int_to_ptr.hbm [resolvable:$true] %s14_s11  ;;  %s17_s13 = int_to_ptr.vmem [resolvable:$true] %s16_s13 }
   0x2   :  { %s202_s15 = smov 8  }
   0x3   :  { %22 = dma.hbm_to_vmem [thread:$0]  %s15_s11, 2048, %s17_s13, [#allocation3], %s201_s14, %s201_s14, %s202_s15  }
   0x4   :  { %198 = dma.done.wait [#allocation3], 2048  }
   0x5   :  { %199 = vsyncadd [#allocation3], 4294965248  ;;  %v203_v0 = vmov 0   ;;  %v204_v1 = vmov 2   ;;  %v205_v2 = vmov 4   ;;  %v27_v3 = vld [vmem:[%s240_s0] sm:$0xff]  ;;  %v28_v42 = vlaneseq }
   0x6   :  { %161 = vset.pattern.permute.xlu0 %v203_v0  ;;  %163 = vset.pattern.permute.xlu1 %v204_v1  ;;  %v40_v4 = vadd.s32 28, %v27_v3  ;;  %v52_v5 = vadd.s32 54, %v27_v3  ;;  %v34_v6 = vadd.s32 22, %v27_v3  ;;  %v46_v7 = vadd.s32 32, %v27_v3  ;;  %v117_v24 = vld [vmem:[#allocation2 + $0x78] sm:$0xff]  ;;  %v116_v25 = vld [vmem:[#allocation2 + $0x70] sm:$0xff] }
   0x7   :  { %165 = vset.pattern.permute.xlu2 %v205_v2  ;;  %31 = vperm.xlu0 %161, %v27_v3   ;;  %v206_v8 = vmov 1   ;;  %v58_v9 = vadd.s32 60, %v27_v3  ;;  %v207_v10 = vmov 3   ;;  %v208_v11 = vmov 5   ;;  %v115_v26 = vld [vmem:[#allocation2 + $0x68] sm:$0xff]  ;;  %v114_v27 = vld [vmem:[#allocation2 + $0x60] sm:$0xff] }
   0x8   :  { %42 = vperm.xlu1 %163, %v40_v4   ;;  %54 = vperm.xlu2 %165, %v52_v5   ;;  %v76_v12 = vadd.s32 92, %v27_v3  ;;  %v64_v13 = vadd.s32 64, %v27_v3  ;;  %v209_v14 = vmov 8   ;;  %v70_v15 = vadd.s32 86, %v27_v3  ;;  %v113_v28 = vld [vmem:[#allocation2 + $0x58] sm:$0xff]  ;;  %v112_v29 = vld [vmem:[#allocation2 + $0x50] sm:$0xff] }
   0x9   :  { %v210_v16 = vmov 6   ;;  %v211_v17 = vmov 7   ;;  %v82_v18 = vadd.s32 96, %v27_v3  ;;  %v88_v19 = vadd.s32 118, %v27_v3  ;;  %118 = vmatpush.msra.mxu0 %v117_v24  ;;  %v111_v30 = vld [vmem:[#allocation2 + $0x48] sm:$0xff]  ;;  %v110_v31 = vld [vmem:[#allocation2 + $0x40] sm:$0xff] }
   0xa   :  { %v212_v20 = vmov 11   ;;  %v213_v21 = vmov 9   ;;  %v214_v22 = vmov 10   ;;  %v94_v23 = vadd.s32 124, %v27_v3  ;;  %v109_v32 = vld [vmem:[#allocation2 + $0x38] sm:$0xff]  ;;  %v108_v33 = vld [vmem:[#allocation2 + $0x30] sm:$0xff] }
   0xb   :  { %119 = vmatpush.msra.mxu0 %v116_v25  ;;  %v107_v34 = vld [vmem:[#allocation2 + $0x28] sm:$0xff]  ;;  %v106_v36 = vld [vmem:[#allocation2 + $0x20] sm:$0xff]  ;;  %v105_v37 = vld [vmem:[#allocation2 + $0x18] sm:$0xff]  ;;  %v29_v45 = vand.u32 127, %v28_v42  ;;  %v215_v54 = vmov 0.0  }
   0xc   :  { %v104_v39 = vld [vmem:[#allocation2 + $0x10] sm:$0xff]  ;;  %v103_v41 = vld [vmem:[#allocation2 + $0x8] sm:$0xff]  ;;  %v102_v43 = vld [vmem:[#allocation2] sm:$0xff] }
   0xd   :  { %120 = vmatpush.msra.mxu0 %v115_v26 }
   0xf   :  { %162 = vset.pattern.permute.xlu0 %v206_v8  ;;  %121 = vmatpush.msra.mxu0 %v114_v27 }
  0x10   :  { %36 = vperm.xlu0 %162, %v34_v6   ;;  %164 = vset.pattern.permute.xlu1 %v207_v10 }
  0x11   :  { %48 = vperm.xlu1 %164, %v46_v7   ;;  %166 = vset.pattern.permute.xlu2 %v208_v11 }
  0x12   :  { %60 = vperm.xlu2 %166, %v58_v9   ;;  %122 = vmatpush.msra.mxu0 %v113_v28 }
  0x14   :  { %123 = vmatpush.msra.mxu0 %v112_v29 }
  0x16   :  { %124 = vmatpush.msra.mxu0 %v111_v30 }
  0x18   :  { %169 = vset.pattern.permute.xlu0 %v209_v14  ;;  %125 = vmatpush.msra.mxu0 %v110_v31 }
  0x19   :  { %78 = vperm.xlu0 %169, %v76_v12   ;;  %167 = vset.pattern.permute.xlu1 %v210_v16 }
  0x1a   :  { %66 = vperm.xlu1 %167, %v64_v13   ;;  %168 = vset.pattern.permute.xlu2 %v211_v17 }
  0x1b   :  { %72 = vperm.xlu2 %168, %v70_v15   ;;  %126 = vmatpush.msra.mxu0 %v109_v32 }
  0x1d   :  { %127 = vmatpush.msra.mxu0 %v108_v33 }
  0x1f   :  { %128 = vmatpush.msra.mxu0 %v107_v34 }
  0x21   :  { %173 = vset.pattern.permute.xlu0 %v212_v20  ;;  %129 = vmatpush.msra.mxu0 %v106_v36 }
  0x22   :  { %170 = vset.pattern.permute.xlu1 %v213_v21 }
  0x23   :  { %84 = vperm.xlu1 %170, %v82_v18   ;;  %171 = vset.pattern.permute.xlu2 %v214_v22 }
  0x24   :  { %90 = vperm.xlu2 %171, %v88_v19   ;;  %130 = vmatpush.msra.mxu0 %v105_v37 }
  0x26   :  { %131 = vmatpush.msra.mxu0 %v104_v39 }
  0x28   :  { %132 = vmatpush.msra.mxu0 %v103_v41 }
  0x2a   :  { %133 = vmatpush.msra.mxu0 %v102_v43 }
  0x2b   :  { %172 = vset.pattern.permute.xlu1 %v212_v20 }
  0x2c   :  { %96 = vperm.xlu1 %172, %v94_v23  }
  0x62   :  { %v55_v40 = vpop.permute.xlu2 %54 }
  0x63   :  { %vm56_vm7 = vcmp.eq.s32.totalorder %v29_v45, %v55_v40 }
  0x6c   :  { %v61_v47 = vpop.permute.xlu2 %60 }
  0x6d   :  { %vm62_vm9 = vcmp.eq.s32.totalorder %v29_v45, %v61_v47 }
  0x75   :  { %v73_v49 = vpop.permute.xlu2 %72 }
  0x76   :  { %vm74_vm13 = vcmp.eq.s32.totalorder %v29_v45, %v73_v49 }
  0x79   :  { %v32_v35 = vpop.permute.xlu0 %31 }
  0x7a   :  { %v43_v38 = vpop.permute.xlu1 %42  ;;  %vm33_vm0 = vcmp.eq.s32.totalorder %v29_v45, %v32_v35 }
  0x7b   :  { %vm44_vm3 = vcmp.eq.s32.totalorder %v29_v45, %v43_v38 }
  0x7e   :  { %v91_v52 = vpop.permute.xlu2 %90 }
  0x82   :  { %v37_v44 = vpop.permute.xlu0 %36 }
  0x83   :  { %v49_v46 = vpop.permute.xlu1 %48  ;;  %vm38_vm1 = vcmp.eq.s32.totalorder %v29_v45, %v37_v44 }
  0x84   :  { %vm39_vm2 = vmor %vm33_vm0, %vm38_vm1  ;;  %vm50_vm5 = vcmp.eq.s32.totalorder %v29_v45, %v49_v46 }
  0x85   :  { %vm45_vm4 = vmor %vm39_vm2, %vm44_vm3  ;;  %vm92_vm3 = vcmp.eq.s32.totalorder %v29_v45, %v91_v52 }
  0x86   :  { %vm51_vm6 = vmor %vm45_vm4, %vm50_vm5 }
  0x87   :  { %vm57_vm8 = vmor %vm51_vm6, %vm56_vm7 }
  0x88   :  { %vm63_vm11 = vmor %vm57_vm8, %vm62_vm9 }
  0x8b   :  { %v79_v50 = vpop.permute.xlu0 %78 }
  0x8c   :  { %v67_v48 = vpop.permute.xlu1 %66  ;;  %vm80_vm15 = vcmp.eq.s32.totalorder %v29_v45, %v79_v50 }
  0x8d   :  { %vm68_vm10 = vcmp.eq.s32.totalorder %v29_v45, %v67_v48 }
  0x8e   :  { %vm69_vm12 = vmor %vm63_vm11, %vm68_vm10 }
  0x8f   :  { %vm75_vm14 = vmor %vm69_vm12, %vm74_vm13 }
  0x90   :  { %vm81_vm1 = vmor %vm75_vm14, %vm80_vm15 }
  0x95   :  { %v85_v51 = vpop.permute.xlu1 %84 }
  0x96   :  { %vm86_vm0 = vcmp.eq.s32.totalorder %v29_v45, %v85_v51 }
  0x97   :  { %vm87_vm2 = vmor %vm81_vm1, %vm86_vm0 }
  0x98   :  { %vm93_vm4 = vmor %vm87_vm2, %vm92_vm3 }
  0x9e   :  { %v97_v53 = vpop.permute.xlu1 %96 }
  0x9f   :  { %vm98_vm5 = vcmp.eq.s32.totalorder %v29_v45, %v97_v53 }
  0xa0   :  { %vm99_vm6 = vmor %vm93_vm4, %vm98_vm5 }
  0xa1   :  { %v144_v55 = vsel %vm99_vm6, 1.0, %v215_v54 }
  0xa2   :  { %134 = vmatmul.f32.vlgmr.msra.gmra.mxu0 %v144_v55 }
 0x11f   :  { %v135_v56 = vpop.f32.mrf.mxu0 }
 0x120   :  { %138 = vst [vmem:[%s242_s2] sm:$0xff] %v135_v56 }
 0x121   :  { %143 = vsyncpa [#allocation3], 1 }

</bundles_post_ra>
